<compile_context>
chip_gen: v6e
topology: v6e:2x2x1
jax: 0.10.0
libtpu: 0.0.40
codegen_flags: <defaults>
</compile_context>

<pallas_src>
import functools

import jax
import jax.numpy as jnp
from jax import lax
from jax.experimental import pallas as pl
from jax.experimental.pallas import tpu as pltpu


def _round_up(n, m):
    return (n + m - 1) // m * m


def _sublane_multiple(dtype):
    # f32 -> 8, bf16 -> 16, int8/fp8 -> 32 (sub-32-bit dtypes pack along sublanes).
    return max(8, 32 // jnp.dtype(dtype).itemsize)


def _int_pow(x, n):
    """x ** n for a static positive integer n via VPU multiplies (no EUP)."""
    assert n >= 1
    result, base = None, x
    while n:
        if n & 1:
            result = base if result is None else result * base
        n >>= 1
        if n:
            base = base * base
    return result


def _pow_static(x, p_static):
    """x ** p_static for x > 0, minimizing EUP work for integer / half-integer p."""
    if p_static == round(p_static) and p_static >= 1.0:
        return _int_pow(x, int(round(p_static)))             # pure VPU
    two_p = 2.0 * p_static
    if two_p == round(two_p) and p_static > 0.0:
        n = int(round(two_p)) // 2                           # p = n + 0.5
        s = jnp.sqrt(x)                                      # single EUP op / elem
        return s if n == 0 else _int_pow(x, n) * s
    return jnp.exp(p_static * jnp.log(x))                    # general: 2 EUP ops


def gem_kernel(p_ref, x_ref, o_ref, acc_ref, *, eps, inv_hw, hw, col_tile,
               mask_cols, p_static):
    """One (row-tile, spatial-chunk) grid step of GeM pooling.

    p_ref : SMEM (1,) learned exponent (ignored when p_static is given)
    x_ref : VMEM (rows, cols) tile of the flattened (B*C, H*W) input
    o_ref : VMEM (rows, 1) output block (resident across the reduction axis)
    acc_ref: VMEM (rows, 1) f32 running sum of clamp(x, eps) ** p
    """
    k = pl.program_id(1)

    @pl.when(k == 0)
    def _():
        acc_ref[...] = jnp.zeros_like(acc_ref)

    x = jnp.maximum(x_ref[...].astype(jnp.float32), eps)

    if mask_cols:
        # Ragged last spatial chunk: lane padding must contribute 0 to the sum.
        col = k * col_tile + lax.broadcasted_iota(jnp.int32, x.shape, 1)
        valid = col < hw

    def _accumulate(xp):
        if mask_cols:
            xp = jnp.where(valid, xp, 0.0)
        acc_ref[...] += jnp.sum(xp, axis=-1, keepdims=True)

    if p_static is not None:
        # Exponent specialized at trace time: integer p never touches the EUP,
        # half-integer p costs one sqrt per element.
        _accumulate(_pow_static(x, float(p_static)))
    else:
        p = p_ref[0]

        # Runtime fast paths for common small integer exponents (module default
        # is p = 3): pure VPU, no per-element transcendentals.
        @pl.when(p == 3.0)
        def _():
            _accumulate(x * x * x)

        @pl.when(p == 2.0)
        def _():
            _accumulate(x * x)

        @pl.when(p == 1.0)
        def _():
            _accumulate(x)

        @pl.when((p != 1.0) & (p != 2.0) & (p != 3.0))
        def _():
            # x >= eps > 0, so x**p == exp(p * log(x)) is well defined.
            _accumulate(jnp.exp(p * jnp.log(x)))

    @pl.when(k == pl.num_programs(1) - 1)
    def _():
        inv_p = (1.0 / float(p_static)) if p_static is not None else 1.0 / p_ref[0]
        m = acc_ref[...] * inv_hw                       # mean over H*W
        # m > 0, so m ** (1/p) == exp(log(m) / p); only `rows` transcendentals.
        o_ref[...] = jnp.exp(jnp.log(m) * inv_p).astype(o_ref.dtype)


def _vmem_budget():
    """(target input-tile bytes, vmem_limit cap) picked per TPU generation."""
    try:
        phys = int(pltpu.get_tpu_info().vmem_capacity_bytes)
    except Exception:
        phys = None
    if phys is None:
        return 8 << 20, 40 << 20            # conservative, safe on every chip
    if phys <= (64 << 20):                  # v7x: 64 MiB VMEM, 3.2 TB/s HBM per TC
        return 16 << 20, 44 << 20
    return 8 << 20, 60 << 20                # v5e / v6e: 128 MiB physical VMEM


def _choose_tiles(bc, hw, dtype, target_bytes):
    """Pick (row_tile, col_tile) so the lane/sublane-PADDED input tile is about
    target_bytes, keeping >= 2 grid steps whenever B*C allows (megacore)."""
    bpe = jnp.dtype(dtype).itemsize
    sub = _sublane_multiple(dtype)
    hw_pad = _round_up(hw, 128)

    if sub * hw_pad * bpe <= target_bytes:
        # Whole spatial extent fits in one tile; tile only the row axis.
        rows = max((target_bytes // (hw_pad * bpe)) // sub * sub, sub)
        if rows >= bc:
            if bc <= sub:
                rows = bc                            # full extent; cannot split legally
            else:
                rows = _round_up((bc + 1) // 2, sub)  # >= 2 steps for both v7x TCs
        return rows, hw
    # Very large H*W: minimal sublane strip of rows, tile the spatial axis too.
    cols = max((target_bytes // (sub * bpe)) // 128 * 128, 128)
    cols = min(cols, hw_pad)
    return sub, cols


def gem_pool(x, p, eps=1e-6, *, p_static=None, tile_rows=None, tile_cols=None):
    """GeM pooling.  x: (B, C, H, W), p: (1,) learned exponent -> (B, C, 1, 1).

    p_static: optional Python float; if given, the kernel is specialized to that
    exponent at compile time (integer -> VPU-only, half-integer -> one sqrt).
    """
    B, C, H, W = x.shape
    bc, hw = B * C, H * W
    x2 = x.reshape(bc, hw)

    target_bytes, vmem_cap = _vmem_budget()
    rows, cols = _choose_tiles(bc, hw, x.dtype, target_bytes)
    if tile_rows is not None:
        rows = tile_rows
    if tile_cols is not None:
        cols = tile_cols
    rows = min(rows, bc)
    cols = min(cols, hw)

    grid = (pl.cdiv(bc, rows), pl.cdiv(hw, cols))
    mask_cols = (hw % cols) != 0

    # VMEM budget from the PADDED tile footprint: 2x double-buffered input tile
    # + output double buffer + accumulator + headroom; capped per generation.
    bpe = jnp.dtype(x.dtype).itemsize
    sub = _sublane_multiple(x.dtype)
    rows_pad = _round_up(rows, sub)
    cols_pad = _round_up(cols, 128)
    need = 2 * rows_pad * cols_pad * bpe + 3 * rows_pad * 128 * 4 + (2 << 20)
    vmem_limit = int(min(max(need, 16 << 20), vmem_cap))

    kernel = functools.partial(
        gem_kernel, eps=float(eps), inv_hw=1.0 / float(hw), hw=hw,
        col_tile=cols, mask_cols=mask_cols, p_static=p_static)

    out = pl.pallas_call(
        kernel,
        out_shape=jax.ShapeDtypeStruct((bc, 1), x.dtype),
        grid=grid,
        in_specs=[
            pl.BlockSpec(memory_space=pltpu.MemorySpace.SMEM),   # p (learned scalar)
            pl.BlockSpec((rows, cols), lambda i, k: (i, k)),     # x tile
        ],
        out_specs=pl.BlockSpec((rows, 1), lambda i, k: (i, 0)),
        scratch_shapes=[pltpu.VMEM((rows, 1), jnp.float32)],
        compiler_params=pltpu.CompilerParams(
            dimension_semantics=("parallel", "arbitrary"),
            vmem_limit_bytes=vmem_limit,
        ),
    )(p, x2)
    return out.reshape(B, C, 1, 1)


def gem_reference(x, p, eps=1e-6):
    xp = jnp.power(jnp.maximum(x, eps), p[0])
    return jnp.power(jnp.mean(xp, axis=(-2, -1), keepdims=True), 1.0 / p[0])


if __name__ == "__main__":
    key = jax.random.PRNGKey(0)
    k0, k1, k2 = jax.random.split(key, 3)
    eps = 1e-6

    # 1) Small shape consistent with the module; p init matches torch.ones(1) * 3.
    B, C, H, W = 2, 4, 16, 16
    x = jax.random.normal(k0, (B, C, H, W), dtype=jnp.float32)
    p3 = jnp.ones((1,), dtype=jnp.float32) * 3.0
    out = jax.block_until_ready(gem_pool(x, p3, eps))
    ref = gem_reference(x, p3, eps)
    assert out.shape == (B, C, 1, 1), out.shape
    assert jnp.allclose(out, ref, rtol=1e-5, atol=1e-6)

    # 2) Fractional runtime p exercises the general exp(p*log(x)) path.
    p_frac = jnp.array([2.5], dtype=jnp.float32)
    out_f = jax.block_until_ready(gem_pool(x, p_frac, eps))
    ref_f = gem_reference(x, p_frac, eps)
    assert jnp.allclose(out_f, ref_f, rtol=1e-5, atol=1e-6)

    # 3) Static half-integer hint: int-pow * sqrt fast path (1 EUP op / element).
    out_s = jax.block_until_ready(gem_pool(x, p_frac, eps, p_static=2.5))
    assert jnp.allclose(out_s, ref_f, rtol=1e-4, atol=1e-6)

    # 4) Multi-tile row grid with a ragged tail: B*C = 40, tile_rows = 16 -> 3
    #    row tiles, last one half-padded (padded rows' outputs are dropped).
    B2, C2, H2, W2 = 5, 8, 16, 16
    x2 = jax.random.normal(k1, (B2, C2, H2, W2), dtype=jnp.float32)
    out2 = jax.block_until_ready(gem_pool(x2, p3, eps, tile_rows=16))
    ref2 = gem_reference(x2, p3, eps)
    assert out2.shape == (B2, C2, 1, 1), out2.shape
    assert jnp.allclose(out2, ref2, rtol=1e-5, atol=1e-6)

    # 5) Spatial-reduction grid axis with a ragged (masked) last chunk:
    #    hw = 160, tile_cols = 128 -> 2 spatial chunks, accumulator path.
    B3, C3, H3, W3 = 2, 4, 16, 10
    x3 = jax.random.normal(k2, (B3, C3, H3, W3), dtype=jnp.float32)
    out3 = jax.block_until_ready(gem_pool(x3, p3, eps, tile_rows=8, tile_cols=128))
    ref3 = gem_reference(x3, p3, eps)
    assert out3.shape == (B3, C3, 1, 1), out3.shape
    assert jnp.allclose(out3, ref3, rtol=1e-5, atol=1e-6)

    print("KERNEL_OK")
</pallas_src>

<mosaic_0001>
module attributes {stable_mosaic.version = 11 : i64} {
  func.func @gem_kernel(%arg0: i32, %arg1: i32, %arg2: memref<1xf32, #tpu.memory_space<smem>>, %arg3: memref<8x256xf32, #tpu.memory_space<vmem>>, %arg4: memref<8x1xf32, #tpu.memory_space<vmem>>, %arg5: memref<8x1xf32, #tpu.memory_space<vmem>>) attributes {dimension_semantics = [#tpu.dimension_semantics<parallel>, #tpu.dimension_semantics<arbitrary>], iteration_bounds = array<i64: 1, 1>, scalar_prefetch = 0 : i64, scratch_operands = 1 : i64, tpu.core_type = #tpu.core_type<tc>, window_params = [{transform_indices = @transform_0, window_bounds = array<i64: 1>}, {transform_indices = @transform_1, window_bounds = array<i64: 8, 256>}, {transform_indices = @transform_2, window_bounds = array<i64: 8, 1>}]} {
    %c0_i32 = arith.constant 0 : i32
    %0 = arith.cmpi eq, %arg1, %c0_i32 : i32
    %1 = arith.extui %0 : i1 to i32
    %c0_i32_0 = arith.constant 0 : i32
    %2 = arith.cmpi ne, %1, %c0_i32_0 : i32
    scf.if %2 {
      %cst_15 = arith.constant 0.000000e+00 : f32
      %26 = vector.broadcast %cst_15 : f32 to vector<8x1xf32>
      %c0_16 = arith.constant 0 : index
      %c0_17 = arith.constant 0 : index
      %27 = vector.load %arg5[%c0_16, %c0_17] : memref<8x1xf32, #tpu.memory_space<vmem>>, vector<8x1xf32>
      tpu.vector_store %arg5[%c0_16, %c0_17], %26 {strides = array<i32>} : memref<8x1xf32, #tpu.memory_space<vmem>>, vector<8x1xf32>,
    } else {
    }
    %c0 = arith.constant 0 : index
    %c0_1 = arith.constant 0 : index
    %3 = vector.load %arg3[%c0, %c0_1] : memref<8x256xf32, #tpu.memory_space<vmem>>, vector<8x256xf32>
    %cst = arith.constant 9.99999997E-7 : f32
    %4 = vector.broadcast %cst : f32 to vector<8x256xf32>
    %5 = arith.maximumf %3, %4 : vector<8x256xf32>
    %c0_2 = arith.constant 0 : index
    %6 = memref.load %arg2[%c0_2] : memref<1xf32, #tpu.memory_space<smem>>
    %cst_3 = arith.constant 3.000000e+00 : f32
    %7 = arith.cmpf oeq, %6, %cst_3 : f32
    %8 = arith.extui %7 : i1 to i32
    %c0_i32_4 = arith.constant 0 : i32
    %9 = arith.cmpi ne, %8, %c0_i32_4 : i32
    scf.if %9 {
      %26 = arith.mulf %5, %5 : vector<8x256xf32>
      %27 = arith.mulf %26, %5 : vector<8x256xf32>
      %c0_15 = arith.constant 0 : index
      %c0_16 = arith.constant 0 : index
      %28 = vector.load %arg5[%c0_15, %c0_16] : memref<8x1xf32, #tpu.memory_space<vmem>>, vector<8x1xf32>
      %cst_17 = arith.constant dense<0.000000e+00> : vector<8xf32>
      %29 = vector.multi_reduction <add>, %27, %cst_17 [1] : vector<8x256xf32> to vector<8xf32>
      %30 = vector.shape_cast %29 : vector<8xf32> to vector<8x1xf32>
      %31 = arith.addf %28, %30 : vector<8x1xf32>
      %c0_18 = arith.constant 0 : index
      %c0_19 = arith.constant 0 : index
      %32 = vector.load %arg5[%c0_18, %c0_19] : memref<8x1xf32, #tpu.memory_space<vmem>>, vector<8x1xf32>
      tpu.vector_store %arg5[%c0_18, %c0_19], %31 {strides = array<i32>} : memref<8x1xf32, #tpu.memory_space<vmem>>, vector<8x1xf32>,
    } else {
    }
    %cst_5 = arith.constant 2.000000e+00 : f32
    %10 = arith.cmpf oeq, %6, %cst_5 : f32
    %11 = arith.extui %10 : i1 to i32
    %c0_i32_6 = arith.constant 0 : i32
    %12 = arith.cmpi ne, %11, %c0_i32_6 : i32
    scf.if %12 {
      %26 = arith.mulf %5, %5 : vector<8x256xf32>
      %c0_15 = arith.constant 0 : index
      %c0_16 = arith.constant 0 : index
      %27 = vector.load %arg5[%c0_15, %c0_16] : memref<8x1xf32, #tpu.memory_space<vmem>>, vector<8x1xf32>
      %cst_17 = arith.constant dense<0.000000e+00> : vector<8xf32>
      %28 = vector.multi_reduction <add>, %26, %cst_17 [1] : vector<8x256xf32> to vector<8xf32>
      %29 = vector.shape_cast %28 : vector<8xf32> to vector<8x1xf32>
      %30 = arith.addf %27, %29 : vector<8x1xf32>
      %c0_18 = arith.constant 0 : index
      %c0_19 = arith.constant 0 : index
      %31 = vector.load %arg5[%c0_18, %c0_19] : memref<8x1xf32, #tpu.memory_space<vmem>>, vector<8x1xf32>
      tpu.vector_store %arg5[%c0_18, %c0_19], %30 {strides = array<i32>} : memref<8x1xf32, #tpu.memory_space<vmem>>, vector<8x1xf32>,
    } else {
    }
    %cst_7 = arith.constant 1.000000e+00 : f32
    %13 = arith.cmpf oeq, %6, %cst_7 : f32
    %14 = arith.extui %13 : i1 to i32
    %c0_i32_8 = arith.constant 0 : i32
    %15 = arith.cmpi ne, %14, %c0_i32_8 : i32
    scf.if %15 {
      %c0_15 = arith.constant 0 : index
      %c0_16 = arith.constant 0 : index
      %26 = vector.load %arg5[%c0_15, %c0_16] : memref<8x1xf32, #tpu.memory_space<vmem>>, vector<8x1xf32>
      %cst_17 = arith.constant dense<0.000000e+00> : vector<8xf32>
      %27 = vector.multi_reduction <add>, %5, %cst_17 [1] : vector<8x256xf32> to vector<8xf32>
      %28 = vector.shape_cast %27 : vector<8xf32> to vector<8x1xf32>
      %29 = arith.addf %26, %28 : vector<8x1xf32>
      %c0_18 = arith.constant 0 : index
      %c0_19 = arith.constant 0 : index
      %30 = vector.load %arg5[%c0_18, %c0_19] : memref<8x1xf32, #tpu.memory_space<vmem>>, vector<8x1xf32>
      tpu.vector_store %arg5[%c0_18, %c0_19], %29 {strides = array<i32>} : memref<8x1xf32, #tpu.memory_space<vmem>>, vector<8x1xf32>,
    } else {
    }
    %cst_9 = arith.constant 1.000000e+00 : f32
    %16 = arith.cmpf one, %6, %cst_9 : f32
    %cst_10 = arith.constant 2.000000e+00 : f32
    %17 = arith.cmpf one, %6, %cst_10 : f32
    %18 = arith.andi %16, %17 : i1
    %cst_11 = arith.constant 3.000000e+00 : f32
    %19 = arith.cmpf one, %6, %cst_11 : f32
    %20 = arith.andi %18, %19 : i1
    %21 = arith.extui %20 : i1 to i32
    %c0_i32_12 = arith.constant 0 : i32
    %22 = arith.cmpi ne, %21, %c0_i32_12 : i32
    scf.if %22 {
      %26 = math.log %5 : vector<8x256xf32>
      %27 = vector.broadcast %6 : f32 to vector<8x256xf32>
      %28 = arith.mulf %27, %26 : vector<8x256xf32>
      %29 = math.exp %28 : vector<8x256xf32>
      %c0_15 = arith.constant 0 : index
      %c0_16 = arith.constant 0 : index
      %30 = vector.load %arg5[%c0_15, %c0_16] : memref<8x1xf32, #tpu.memory_space<vmem>>, vector<8x1xf32>
      %cst_17 = arith.constant dense<0.000000e+00> : vector<8xf32>
      %31 = vector.multi_reduction <add>, %29, %cst_17 [1] : vector<8x256xf32> to vector<8xf32>
      %32 = vector.shape_cast %31 : vector<8xf32> to vector<8x1xf32>
      %33 = arith.addf %30, %32 : vector<8x1xf32>
      %c0_18 = arith.constant 0 : index
      %c0_19 = arith.constant 0 : index
      %34 = vector.load %arg5[%c0_18, %c0_19] : memref<8x1xf32, #tpu.memory_space<vmem>>, vector<8x1xf32>
      tpu.vector_store %arg5[%c0_18, %c0_19], %33 {strides = array<i32>} : memref<8x1xf32, #tpu.memory_space<vmem>>, vector<8x1xf32>,
    } else {
    }
    %c0_i32_13 = arith.constant 0 : i32
    %23 = arith.cmpi eq, %arg1, %c0_i32_13 : i32
    %24 = arith.extui %23 : i1 to i32
    %c0_i32_14 = arith.constant 0 : i32
    %25 = arith.cmpi ne, %24, %c0_i32_14 : i32
    scf.if %25 {
      %c0_15 = arith.constant 0 : index
      %26 = memref.load %arg2[%c0_15] : memref<1xf32, #tpu.memory_space<smem>>
      %cst_16 = arith.constant 1.000000e+00 : f32
      %27 = arith.divf %cst_16, %26 : f32
      %c0_17 = arith.constant 0 : index
      %c0_18 = arith.constant 0 : index
      %28 = vector.load %arg5[%c0_17, %c0_18] : memref<8x1xf32, #tpu.memory_space<vmem>>, vector<8x1xf32>
      %cst_19 = arith.constant 3.906250e-03 : f32
      %29 = vector.broadcast %cst_19 : f32 to vector<8x1xf32>
      %30 = arith.mulf %28, %29 : vector<8x1xf32>
      %31 = math.log %30 : vector<8x1xf32>
      %32 = vector.broadcast %27 : f32 to vector<8x1xf32>
      %33 = arith.mulf %31, %32 : vector<8x1xf32>
      %34 = math.exp %33 : vector<8x1xf32>
      %c0_20 = arith.constant 0 : index
      %c0_21 = arith.constant 0 : index
      %35 = vector.load %arg4[%c0_20, %c0_21] : memref<8x1xf32, #tpu.memory_space<vmem>>, vector<8x1xf32>
      tpu.vector_store %arg4[%c0_20, %c0_21], %34 {strides = array<i32>} : memref<8x1xf32, #tpu.memory_space<vmem>>, vector<8x1xf32>,
    } else {
    }
    return
  }
  func.func @transform_0(%arg0: i32, %arg1: i32) -> i32 {
    %c0_i32 = arith.constant 0 : i32
    %c0_i32_0 = arith.constant 0 : i32
    return %c0_i32 : i32
  }
  func.func @transform_1(%arg0: i32, %arg1: i32) -> (i32, i32) {
    %c0_i32 = arith.constant 0 : i32
    return %arg0, %arg1 : i32, i32
  }
  func.func @transform_2(%arg0: i32, %arg1: i32) -> (i32, i32) {
    %c0_i32 = arith.constant 0 : i32
    %c0_i32_0 = arith.constant 0 : i32
    return %arg0, %c0_i32 : i32, i32
  }
}

</mosaic_0001>

<bundles_post_ra>
// kernel: tpu_custom_call.1
= control target key start
LH: loop header
LB: loop body
LE: loop exit
PB: predicated region body
PF: predicated region fallthrough
CT: control target
= control target key end

     0   :  { %s204_s0 = inlined_call_operand.<no memory space> [shape: f32[1], index: 0, kind: input, shape index: {}]   ;;  %s205_s1 = inlined_call_operand.hbm [shape: f32[8,256], index: 1, kind: input, shape index: {}]   ;;  %s206_s2 = inlined_call_operand.vmem [shape: f32[8,1], index: 2, kind: output, shape index: {}]  }
   0x1   :  { %7 = sst [smem:[#allocation3]] %s204_s0 }
   0x2   :  { %8 = vsyncpa [#allocation5], 0  ;;  %s163_s11 = smov [#allocation4]  }
   0x3   :  { %s17_s12 = sshll.u32 %s163_s11, 4  ;;  %s18_s12 = int_to_ptr.vmem [resolvable:$true] %s17_s12 }
   0x4   :  { %s149_s13 = scalar_lea.vmem %s18_s12, 256  ;;  %p154_p1 = scmp.lt.s32.totalorder %s18_s12, %s18_s12 }
   0x5   :  { %p150_p0 = scmp.ne.s32.totalorder %s18_s12, %s149_s13  ;;  %p155_p2 = scmp.lt.s32.totalorder %s149_s13, %s149_s13 }
   0x7   :  { %p156_p3 = por %p155_p2, %p154_p1 }
   0x9   :  { %p157_p4 = pnand %p156_p3, %p150_p0 }
   0xb   :  { %160 = shalt.err (!%p157_p4)
}
   0xc   :  { %20 = dma.hbm_to_vmem [thread:$0]  %s205_s1, 256, %s18_s12, [#allocation5]  }
   0xd   :  { %161 = dma.done.wait [#allocation5], 256  }
   0xe   :  { %162 = vsyncadd [#allocation5], 4294967040  ;;  %vm28_vm0 = vcmask 7168   ;;  %s186_s16 = sld [smem:[#allocation3]]  ;;  %v164_v0 = vmov 0.0   ;;  %v30_v1 = vld [vmem:[#allocation4] sm:$0xff] }
   0xf   :  { %29 = vst.msk [vmem:[#allocation2] sm:$0xff] %vm28_vm0, %v164_v0  ;;  %v31_v2 = vld [vmem:[#allocation4 + $0x8] sm:$0xff]  ;;  %v32_v3 = vmax.f32 %v30_v1, 1e-06 }
  0x10   :  { %v33_v4 = vmax.f32 %v31_v2, 1e-06 }
  0x14   :  { %p35_p5 = scmp.eq.f32.partialorder %s186_s16, 3.0 }
  0x15   :  { %v39_v5 = vmul.f32 (%p35_p5), %v32_v3, %v32_v3  ;;  %v40_v6 = vmul.f32 (%p35_p5), %v33_v4, %v33_v4 }
  0x16   :  { %38 = sbr.rel (!%p35_p5) target bundleno = 168 (0xa8), region = 21  ;;  %v43_v10 = vld [vmem:[#allocation2] sm:$0xff] (%p35_p5) }
  0x17   :  { %v41_v7 = vmul.f32 (%p35_p5), %v39_v5, %v32_v3  ;;  %v42_v8 = vmul.f32 (%p35_p5), %v40_v6, %v33_v4 }
  0x19   :  { %v44_v9 = vadd.f32 (%p35_p5), %v42_v8, %v41_v7 }
  0x1b   :  { %45 = vadd.xlane.f32.xlu0 %v44_v9 }
  0xa4   :  { %v46_v11 = vpop.xlane.xlu0 %45 }
  0xa5   :  { %v47_v12 = vadd.f32 %v46_v11, %v43_v10 }
  0xa7   :  { %49 = vst.msk [vmem:[#allocation2] sm:$0xff] %vm28_vm0, %v47_v12 }
  0xa8 PF:  { %p50_p6 = scmp.eq.f32.partialorder %s186_s16, 2.0 }
  0xa9   :  { %v54_v13 = vmul.f32 (%p50_p6), %v32_v3, %v32_v3  ;;  %v55_v14 = vmul.f32 (%p50_p6), %v33_v4, %v33_v4 }
  0xaa   :  { %53 = sbr.rel (!%p50_p6) target bundleno = 314 (0x13a), region = 25 }
  0xab   :  { %v57_v15 = vadd.f32 (%p50_p6), %v55_v14, %v54_v13 }
  0xad   :  { %58 = vadd.xlane.f32.xlu0 (%p50_p6), %v57_v15 }
  0xae   :  { %v56_v16 = vld [vmem:[#allocation2] sm:$0xff] (%p50_p6) }
 0x136   :  { %v59_v17 = vpop.xlane.xlu0 %58 }
 0x137   :  { %v60_v18 = vadd.f32 %v59_v17, %v56_v16 }
 0x139   :  { %62 = vst.msk [vmem:[#allocation2] sm:$0xff] %vm28_vm0, %v60_v18 }
 0x13a PF:  { %p63_p7 = scmp.eq.f32.partialorder %s186_s16, 1.0 }
 0x13b   :  { %v68_v19 = vadd.f32 (%p63_p7), %v33_v4, %v32_v3 }
 0x13c   :  { %66 = sbr.rel (!%p63_p7) target bundleno = 458 (0x1ca), region = 29 }
 0x13d   :  { %69 = vadd.xlane.f32.xlu0 (%p63_p7), %v68_v19 }
 0x140   :  { %v67_v20 = vld [vmem:[#allocation2] sm:$0xff] (%p63_p7) }
 0x1c6   :  { %v70_v21 = vpop.xlane.xlu0 %69 }
 0x1c7   :  { %v71_v22 = vadd.f32 %v70_v21, %v67_v20 }
 0x1c9   :  { %73 = vst.msk [vmem:[#allocation2] sm:$0xff] %vm28_vm0, %v71_v22 }
 0x1ca PF:  { %p74_p8 = scmp.ne.f32.partialorder %s186_s16, 1.0  ;;  %p75_p9 = scmp.ne.f32.partialorder %s186_s16, 2.0 }
 0x1cb   :  { %p78_p11 = scmp.ne.f32.partialorder %s186_s16, 3.0 }
 0x1cc   :  { %p76_p10 = pnand %p75_p9, %p74_p8 }
 0x1ce   :  { %p77_p12 = pneg %p76_p10 }
 0x1d0   :  { %p79_p13 = pnand %p78_p11, %p77_p12 }
 0x1d2   :  { %82 = sbr.rel (%p79_p13) target bundleno = 649 (0x289), region = 33 }
 0x1d7   :  { %127 = vlog2.f32 %v32_v3  ;;  %v87_v24 = vstv %s186_s16  ;;  %v94_v35 = vld [vmem:[#allocation2] sm:$0xff] }
 0x1d8   :  { %129 = vlog2.f32 %v33_v4 }
 0x1e4   :  { %v128_v23 = vpop.eup %127 }
 0x1e5   :  { %v130_v25 = vpop.eup %129  ;;  %v84_v26 = vmul.f32 0.6931472, %v128_v23 }
 0x1e6   :  { %v86_v27 = vmul.f32 0.6931472, %v130_v25 }
 0x1e7   :  { %v88_v28 = vmul.f32 %v87_v24, %v84_v26 }
 0x1e8   :  { %v89_v29 = vmul.f32 %v87_v24, %v86_v27 }
 0x1e9   :  { %v90_v30 = vmul.f32 1.442695, %v88_v28 }
 0x1ea   :  { %v92_v31 = vmul.f32 1.442695, %v89_v29 }
 0x1eb   :  { %131 = vpow2.f32 %v90_v30 }
 0x1ec   :  { %133 = vpow2.f32 %v92_v31 }
 0x1f8   :  { %v132_v32 = vpop.eup %131 }
 0x1f9   :  { %v134_v33 = vpop.eup %133 }
 0x1fa   :  { %v95_v34 = vadd.f32 %v134_v33, %v132_v32 }
 0x1fc   :  { %96 = vadd.xlane.f32.xlu0 %v95_v34 }
 0x285   :  { %v97_v36 = vpop.xlane.xlu0 %96 }
 0x286   :  { %v98_v37 = vadd.f32 %v97_v36, %v94_v35 }
 0x288   :  { %100 = vst.msk [vmem:[#allocation2] sm:$0xff] %vm28_vm0, %v98_v37 }
 0x289 PF:  { %s104_s0 = sld [smem:[#allocation3]] }
 0x28f   :  { %v105_v38 = vstv %s104_s0  ;;  %v108_v40 = vld [vmem:[#allocation2] sm:$0xff] }
 0x290   :  { %135 = vrcp.f32 %v105_v38  ;;  %v109_v41 = vmul.f32 0.00390625, %v108_v40 }
 0x292   :  { %137 = vlog2.f32 %v109_v41 }
 0x29d   :  { %v136_v39 = vpop.eup %135 }
 0x29e   :  { %123 = vpush %v136_v39 }
 0x29f   :  { %v138_v42 = vpop.eup %137 }
 0x2a0   :  { %v111_v43 = vmul.f32 0.6931472, %v138_v42 }
 0x2cf   :  { %s124_s1 = spop %123 }
 0x2d0   :  { %v112_v44 = vstv %s124_s1 }
 0x2d1   :  { %v113_v45 = vmul.f32 %v112_v44, %v111_v43 }
 0x2d3   :  { %v114_v46 = vmul.f32 1.442695, %v113_v45 }
 0x2d5   :  { %139 = vpow2.f32 %v114_v46 }
 0x2e2   :  { %v140_v47 = vpop.eup %139 }
 0x2e3   :  { %117 = vst.msk [vmem:[%s206_s2] sm:$0xff] %vm28_vm0, %v140_v47 }
 0x2e4   :  { %122 = vsyncpa [#allocation5], 1 }

</bundles_post_ra>
